<compile_context>
chip_gen: v5e
topology: v5e:2x2
jax: 0.10.0
libtpu: 0.0.40
codegen_flags: <defaults>
</compile_context>

<pallas_src>
import math
import functools

import jax
import jax.numpy as jnp
from jax.experimental import pallas as pl
from jax.experimental.pallas import tpu as pltpu


def _mha_kernel(qkv_ref, wqkv_ref, bqkv_ref, wo_ref, bo_ref, out_ref,
                *, heads, d_k):
    # Current batch element: (3, S, D) = stacked q, k, v streams.
    x = qkv_ref[...]          # (3, 1, S, D)
    x = x[:, 0]               # (3, S, D)

    # Fused, pre-transposed QKV projection: one batched MXU matmul.
    # (1/sqrt(d_k) is already folded into the q weights/bias in the wrapper.)
    proj = jnp.einsum('tsd,tde->tse', x, wqkv_ref[...],
                      preferred_element_type=jnp.float32) + bqkv_ref[...]

    qp, kp, vp = proj[0], proj[1], proj[2]          # each (S, D)

    def split_heads(x2d):
        # (S, D) -> (heads, S, d_k): head-major batch layout for the
        # batched attention einsums (no lane-splitting reshape needed).
        return jnp.stack(
            [x2d[:, h * d_k:(h + 1) * d_k] for h in range(heads)], axis=0)

    qh = split_heads(qp)
    kh = split_heads(kp)
    vh = split_heads(vp)

    # Head-batched scaled dot-product attention (scale folded into qh).
    s = jnp.einsum('hqd,hkd->hqk', qh, kh,
                   preferred_element_type=jnp.float32)      # (H, S, S)
    # TODO(synk): attention-mask fill would go here (mask == 0 -> -1e9).
    m = jnp.max(s, axis=-1, keepdims=True)
    e = jnp.exp(s - m)
    denom = jnp.sum(e, axis=-1, keepdims=True)
    p = e * pl.reciprocal(denom, approx=True)                # EUP reciprocal
    # (dropout is identity in eval mode)
    pv = jnp.einsum('hqk,hkd->hqd', p, vh,
                    preferred_element_type=jnp.float32)      # (H, S, d_k)

    # Output projection with the head concat folded in:
    #   out = sum_h pv[h] @ Wo^T[h*d_k:(h+1)*d_k, :] + bo
    acc = jnp.dot(pv[0], wo_ref[0], preferred_element_type=jnp.float32)
    for h in range(1, heads):
        acc = acc + jnp.dot(pv[h], wo_ref[h],
                            preferred_element_type=jnp.float32)
    out_ref[0] = (acc + bo_ref[...]).astype(out_ref.dtype)


def multi_head_attention(q, k, v, params, *, heads):
    """q, k, v: (bs, S, d_model) float32.  params: dict of weights/biases."""
    bs, S, D = q.shape
    assert D % heads == 0, "d_model must be divisible by heads"
    d_k = D // heads
    inv_sqrt_dk = 1.0 / math.sqrt(d_k)

    # One-time (per-call) weight packing: pre-transposed, fused, head-split.
    wq_t = (params["wq"] * inv_sqrt_dk).T
    bq_s = params["bq"] * inv_sqrt_dk
    wqkv_t = jnp.stack([wq_t, params["wk"].T, params["wv"].T], axis=0)  # (3, D, D)
    bqkv = jnp.stack([bq_s, params["bk"], params["bv"]], axis=0)        # (3, 1, D)
    wo_heads = params["wo"].T.reshape(heads, d_k, D)                    # (H, d_k, D)
    bo = params["bo"]                                                   # (1, D)

    qkv = jnp.stack([q, k, v], axis=0)                                  # (3, bs, S, D)

    kernel = functools.partial(_mha_kernel, heads=heads, d_k=d_k)

    qkv_spec = pl.BlockSpec((3, 1, S, D), lambda b: (0, b, 0, 0))
    wqkv_spec = pl.BlockSpec((3, D, D), lambda b: (0, 0, 0))
    bqkv_spec = pl.BlockSpec((3, 1, D), lambda b: (0, 0, 0))
    wo_spec = pl.BlockSpec((heads, d_k, D), lambda b: (0, 0, 0))
    bo_spec = pl.BlockSpec((1, D), lambda b: (0, 0))
    out_spec = pl.BlockSpec((1, S, D), lambda b: (b, 0, 0))

    return pl.pallas_call(
        kernel,
        out_shape=jax.ShapeDtypeStruct((bs, S, D), q.dtype),
        grid_spec=pltpu.PrefetchScalarGridSpec(
            num_scalar_prefetch=0,
            grid=(bs,),
            in_specs=[qkv_spec, wqkv_spec, bqkv_spec, wo_spec, bo_spec],
            out_specs=out_spec,
        ),
        compiler_params=pltpu.CompilerParams(
            dimension_semantics=("parallel",),
            vmem_limit_bytes=32 * 1024 * 1024),
    )(qkv, wqkv_t, bqkv, wo_heads, bo)


def _reference_mha(q, k, v, params, *, heads):
    """Pure-JAX reference mirroring the PyTorch forward (eval mode)."""
    bs, S, D = q.shape
    d_k = D // heads

    def lin(x, w, b):
        return x @ w.T + b[0]

    qp = lin(q, params["wq"], params["bq"]).reshape(bs, S, heads, d_k).transpose(0, 2, 1, 3)
    kp = lin(k, params["wk"], params["bk"]).reshape(bs, S, heads, d_k).transpose(0, 2, 1, 3)
    vp = lin(v, params["wv"], params["bv"]).reshape(bs, S, heads, d_k).transpose(0, 2, 1, 3)

    scores = jnp.einsum("bhqd,bhkd->bhqk", qp, kp) / math.sqrt(d_k)
    scores = jax.nn.softmax(scores, axis=-1)
    out = jnp.einsum("bhqk,bhkd->bhqd", scores, vp)
    concat = out.transpose(0, 2, 1, 3).reshape(bs, S, D)
    return lin(concat, params["wo"], params["bo"])


def init_params(key, d_model):
    ks = jax.random.split(key, 8)
    bound = 1.0 / math.sqrt(d_model)

    def u(k, shape):
        return jax.random.uniform(k, shape, jnp.float32, -bound, bound)

    return {
        "wq": u(ks[0], (d_model, d_model)), "bq": u(ks[1], (1, d_model)),
        "wk": u(ks[2], (d_model, d_model)), "bk": u(ks[3], (1, d_model)),
        "wv": u(ks[4], (d_model, d_model)), "bv": u(ks[5], (1, d_model)),
        "wo": u(ks[6], (d_model, d_model)), "bo": u(ks[7], (1, d_model)),
    }


if __name__ == "__main__":
    heads = 4
    d_model = 32
    bs = 2
    seq = 8

    key = jax.random.PRNGKey(0)
    kq, kk, kv, kp = jax.random.split(key, 4)
    q = jax.random.normal(kq, (bs, seq, d_model), jnp.float32)
    k = jax.random.normal(kk, (bs, seq, d_model), jnp.float32)
    v = jax.random.normal(kv, (bs, seq, d_model), jnp.float32)
    params = init_params(kp, d_model)

    out = multi_head_attention(q, k, v, params, heads=heads)
    out = jax.block_until_ready(out)

    ref = _reference_mha(q, k, v, params, heads=heads)
    assert out.shape == (bs, seq, d_model)
    # approx=True reciprocal in the softmax -> allow a slightly looser tolerance.
    assert jnp.allclose(out, ref, atol=5e-3, rtol=5e-3), "mismatch vs reference"

    print("KERNEL_OK")
</pallas_src>

<mosaic_0001>
module attributes {stable_mosaic.version = 11 : i64} {
  func.func @_mha_kernel(%arg0: i32, %arg1: memref<3x1x8x32xf32, #tpu.memory_space<vmem>>, %arg2: memref<3x32x32xf32, #tpu.memory_space<vmem>>, %arg3: memref<3x1x32xf32, #tpu.memory_space<vmem>>, %arg4: memref<4x8x32xf32, #tpu.memory_space<vmem>>, %arg5: memref<1x32xf32, #tpu.memory_space<vmem>>, %arg6: memref<1x8x32xf32, #tpu.memory_space<vmem>>) attributes {dimension_semantics = [#tpu.dimension_semantics<parallel>], iteration_bounds = array<i64: 2>, scalar_prefetch = 0 : i64, scratch_operands = 0 : i64, tpu.core_type = #tpu.core_type<tc>, window_params = [{transform_indices = @transform_0, window_bounds = array<i64: 3, 1, 8, 32>}, {pipeline_mode = #tpu.pipeline_mode<synchronous>, transform_indices = @transform_1, window_bounds = array<i64: 3, 32, 32>}, {pipeline_mode = #tpu.pipeline_mode<synchronous>, transform_indices = @transform_2, window_bounds = array<i64: 3, 1, 32>}, {pipeline_mode = #tpu.pipeline_mode<synchronous>, transform_indices = @transform_3, window_bounds = array<i64: 4, 8, 32>}, {pipeline_mode = #tpu.pipeline_mode<synchronous>, transform_indices = @transform_4, window_bounds = array<i64: 1, 32>}, {transform_indices = @transform_5, window_bounds = array<i64: 1, 8, 32>}]} {
    %c0 = arith.constant 0 : index
    %c0_0 = arith.constant 0 : index
    %c0_1 = arith.constant 0 : index
    %c0_2 = arith.constant 0 : index
    %0 = vector.load %arg1[%c0, %c0_0, %c0_1, %c0_2] : memref<3x1x8x32xf32, #tpu.memory_space<vmem>>, vector<3x1x8x32xf32>
    %1 = vector.shape_cast %0 : vector<3x1x8x32xf32> to vector<3x8x32xf32>
    %c0_3 = arith.constant 0 : index
    %c0_4 = arith.constant 0 : index
    %c0_5 = arith.constant 0 : index
    %2 = vector.load %arg2[%c0_3, %c0_4, %c0_5] : memref<3x32x32xf32, #tpu.memory_space<vmem>>, vector<3x32x32xf32>
    "tpu.trace_start"() <{level = 10 : i32, message = "tsd,tde->tse"}> : () -> ()
    %cst = arith.constant dense<0.000000e+00> : vector<3x8x32xf32>
    %3 = tpu.matmul %1, %2, %cst {dimension_numbers = #tpu.dot_dimension_numbers<[2], [1], [1], [2], [0, 0, 0, 1, 1, 2], [0], [0]>} : vector<3x8x32xf32>, vector<3x32x32xf32>, vector<3x8x32xf32> -> vector<3x8x32xf32>
    "tpu.trace_stop"() : () -> ()
    %c0_6 = arith.constant 0 : index
    %c0_7 = arith.constant 0 : index
    %c0_8 = arith.constant 0 : index
    %4 = vector.load %arg3[%c0_6, %c0_7, %c0_8] : memref<3x1x32xf32, #tpu.memory_space<vmem>>, vector<3x1x32xf32>
    %5 = vector.broadcast %4 : vector<3x1x32xf32> to vector<3x8x32xf32>
    %6 = arith.addf %3, %5 : vector<3x8x32xf32>
    %7 = vector.extract_strided_slice %6 {offsets = [0, 0, 0], sizes = [1, 8, 32], strides = [1, 1, 1]} : vector<3x8x32xf32> to vector<1x8x32xf32>
    %8 = vector.shape_cast %7 : vector<1x8x32xf32> to vector<8x32xf32>
    %9 = vector.extract_strided_slice %6 {offsets = [1, 0, 0], sizes = [1, 8, 32], strides = [1, 1, 1]} : vector<3x8x32xf32> to vector<1x8x32xf32>
    %10 = vector.shape_cast %9 : vector<1x8x32xf32> to vector<8x32xf32>
    %11 = vector.extract_strided_slice %6 {offsets = [2, 0, 0], sizes = [1, 8, 32], strides = [1, 1, 1]} : vector<3x8x32xf32> to vector<1x8x32xf32>
    %12 = vector.shape_cast %11 : vector<1x8x32xf32> to vector<8x32xf32>
    %13 = vector.extract_strided_slice %8 {offsets = [0, 0], sizes = [8, 8], strides = [1, 1]} : vector<8x32xf32> to vector<8x8xf32>
    %14 = vector.extract_strided_slice %8 {offsets = [0, 8], sizes = [8, 8], strides = [1, 1]} : vector<8x32xf32> to vector<8x8xf32>
    %15 = vector.extract_strided_slice %8 {offsets = [0, 16], sizes = [8, 8], strides = [1, 1]} : vector<8x32xf32> to vector<8x8xf32>
    %16 = vector.extract_strided_slice %8 {offsets = [0, 24], sizes = [8, 8], strides = [1, 1]} : vector<8x32xf32> to vector<8x8xf32>
    %17 = vector.shape_cast %13 : vector<8x8xf32> to vector<1x8x8xf32>
    %18 = vector.shape_cast %14 : vector<8x8xf32> to vector<1x8x8xf32>
    %19 = vector.shape_cast %15 : vector<8x8xf32> to vector<1x8x8xf32>
    %20 = vector.shape_cast %16 : vector<8x8xf32> to vector<1x8x8xf32>
    %21 = tpu.concatenate %17, %18, %19, %20 in 0 : vector<1x8x8xf32>, vector<1x8x8xf32>, vector<1x8x8xf32>, vector<1x8x8xf32> -> vector<4x8x8xf32>
    %22 = vector.extract_strided_slice %10 {offsets = [0, 0], sizes = [8, 8], strides = [1, 1]} : vector<8x32xf32> to vector<8x8xf32>
    %23 = vector.extract_strided_slice %10 {offsets = [0, 8], sizes = [8, 8], strides = [1, 1]} : vector<8x32xf32> to vector<8x8xf32>
    %24 = vector.extract_strided_slice %10 {offsets = [0, 16], sizes = [8, 8], strides = [1, 1]} : vector<8x32xf32> to vector<8x8xf32>
    %25 = vector.extract_strided_slice %10 {offsets = [0, 24], sizes = [8, 8], strides = [1, 1]} : vector<8x32xf32> to vector<8x8xf32>
    %26 = vector.shape_cast %22 : vector<8x8xf32> to vector<1x8x8xf32>
    %27 = vector.shape_cast %23 : vector<8x8xf32> to vector<1x8x8xf32>
    %28 = vector.shape_cast %24 : vector<8x8xf32> to vector<1x8x8xf32>
    %29 = vector.shape_cast %25 : vector<8x8xf32> to vector<1x8x8xf32>
    %30 = tpu.concatenate %26, %27, %28, %29 in 0 : vector<1x8x8xf32>, vector<1x8x8xf32>, vector<1x8x8xf32>, vector<1x8x8xf32> -> vector<4x8x8xf32>
    %31 = vector.extract_strided_slice %12 {offsets = [0, 0], sizes = [8, 8], strides = [1, 1]} : vector<8x32xf32> to vector<8x8xf32>
    %32 = vector.extract_strided_slice %12 {offsets = [0, 8], sizes = [8, 8], strides = [1, 1]} : vector<8x32xf32> to vector<8x8xf32>
    %33 = vector.extract_strided_slice %12 {offsets = [0, 16], sizes = [8, 8], strides = [1, 1]} : vector<8x32xf32> to vector<8x8xf32>
    %34 = vector.extract_strided_slice %12 {offsets = [0, 24], sizes = [8, 8], strides = [1, 1]} : vector<8x32xf32> to vector<8x8xf32>
    %35 = vector.shape_cast %31 : vector<8x8xf32> to vector<1x8x8xf32>
    %36 = vector.shape_cast %32 : vector<8x8xf32> to vector<1x8x8xf32>
    %37 = vector.shape_cast %33 : vector<8x8xf32> to vector<1x8x8xf32>
    %38 = vector.shape_cast %34 : vector<8x8xf32> to vector<1x8x8xf32>
    %39 = tpu.concatenate %35, %36, %37, %38 in 0 : vector<1x8x8xf32>, vector<1x8x8xf32>, vector<1x8x8xf32>, vector<1x8x8xf32> -> vector<4x8x8xf32>
    "tpu.trace_start"() <{level = 10 : i32, message = "hqd,hkd->hqk"}> : () -> ()
    %cst_9 = arith.constant dense<0.000000e+00> : vector<4x8x8xf32>
    %40 = tpu.matmul %21, %30, %cst_9 {dimension_numbers = #tpu.dot_dimension_numbers<[2], [2], [1], [1], [0, 0, 0, 1, 1, 1], [0], [0]>} : vector<4x8x8xf32>, vector<4x8x8xf32>, vector<4x8x8xf32> -> vector<4x8x8xf32>
    "tpu.trace_stop"() : () -> ()
    %cst_10 = arith.constant dense<0xFF800000> : vector<4x8xf32>
    %41 = vector.multi_reduction <maximumf>, %40, %cst_10 [2] : vector<4x8x8xf32> to vector<4x8xf32>
    %42 = vector.shape_cast %41 : vector<4x8xf32> to vector<4x8x1xf32>
    %43 = vector.broadcast %42 : vector<4x8x1xf32> to vector<4x8x8xf32>
    %44 = arith.subf %40, %43 : vector<4x8x8xf32>
    %45 = math.exp %44 : vector<4x8x8xf32>
    %cst_11 = arith.constant dense<0.000000e+00> : vector<4x8xf32>
    %46 = vector.multi_reduction <add>, %45, %cst_11 [2] : vector<4x8x8xf32> to vector<4x8xf32>
    %47 = vector.shape_cast %46 : vector<4x8xf32> to vector<4x8x1xf32>
    %48 = tpu.reciprocal %47 {approx = true} : vector<4x8x1xf32> -> vector<4x8x1xf32>
    %49 = vector.broadcast %48 : vector<4x8x1xf32> to vector<4x8x8xf32>
    %50 = arith.mulf %45, %49 : vector<4x8x8xf32>
    "tpu.trace_start"() <{level = 10 : i32, message = "hqk,hkd->hqd"}> : () -> ()
    %cst_12 = arith.constant dense<0.000000e+00> : vector<4x8x8xf32>
    %51 = tpu.matmul %50, %39, %cst_12 {dimension_numbers = #tpu.dot_dimension_numbers<[2], [1], [1], [2], [0, 0, 0, 1, 1, 2], [0], [0]>} : vector<4x8x8xf32>, vector<4x8x8xf32>, vector<4x8x8xf32> -> vector<4x8x8xf32>
    "tpu.trace_stop"() : () -> ()
    %52 = vector.extract_strided_slice %51 {offsets = [0, 0, 0], sizes = [1, 8, 8], strides = [1, 1, 1]} : vector<4x8x8xf32> to vector<1x8x8xf32>
    %53 = vector.shape_cast %52 : vector<1x8x8xf32> to vector<8x8xf32>
    %c0_13 = arith.constant 0 : index
    %c0_14 = arith.constant 0 : index
    %c0_15 = arith.constant 0 : index
    %54 = vector.load %arg4[%c0_13, %c0_14, %c0_15] : memref<4x8x32xf32, #tpu.memory_space<vmem>>, vector<1x8x32xf32>
    %55 = vector.shape_cast %54 : vector<1x8x32xf32> to vector<8x32xf32>
    %cst_16 = arith.constant dense<0.000000e+00> : vector<8x32xf32>
    %56 = tpu.matmul %53, %55, %cst_16 {dimension_numbers = #tpu.dot_dimension_numbers<[1], [0], [0], [1], [0, 0, 1, 1], [], []>} : vector<8x8xf32>, vector<8x32xf32>, vector<8x32xf32> -> vector<8x32xf32>
    %57 = vector.extract_strided_slice %51 {offsets = [1, 0, 0], sizes = [1, 8, 8], strides = [1, 1, 1]} : vector<4x8x8xf32> to vector<1x8x8xf32>
    %58 = vector.shape_cast %57 : vector<1x8x8xf32> to vector<8x8xf32>
    %c1 = arith.constant 1 : index
    %c0_17 = arith.constant 0 : index
    %c0_18 = arith.constant 0 : index
    %59 = vector.load %arg4[%c1, %c0_17, %c0_18] : memref<4x8x32xf32, #tpu.memory_space<vmem>>, vector<1x8x32xf32>
    %60 = vector.shape_cast %59 : vector<1x8x32xf32> to vector<8x32xf32>
    %cst_19 = arith.constant dense<0.000000e+00> : vector<8x32xf32>
    %61 = tpu.matmul %58, %60, %cst_19 {dimension_numbers = #tpu.dot_dimension_numbers<[1], [0], [0], [1], [0, 0, 1, 1], [], []>} : vector<8x8xf32>, vector<8x32xf32>, vector<8x32xf32> -> vector<8x32xf32>
    %62 = arith.addf %56, %61 : vector<8x32xf32>
    %63 = vector.extract_strided_slice %51 {offsets = [2, 0, 0], sizes = [1, 8, 8], strides = [1, 1, 1]} : vector<4x8x8xf32> to vector<1x8x8xf32>
    %64 = vector.shape_cast %63 : vector<1x8x8xf32> to vector<8x8xf32>
    %c2 = arith.constant 2 : index
    %c0_20 = arith.constant 0 : index
    %c0_21 = arith.constant 0 : index
    %65 = vector.load %arg4[%c2, %c0_20, %c0_21] : memref<4x8x32xf32, #tpu.memory_space<vmem>>, vector<1x8x32xf32>
    %66 = vector.shape_cast %65 : vector<1x8x32xf32> to vector<8x32xf32>
    %cst_22 = arith.constant dense<0.000000e+00> : vector<8x32xf32>
    %67 = tpu.matmul %64, %66, %cst_22 {dimension_numbers = #tpu.dot_dimension_numbers<[1], [0], [0], [1], [0, 0, 1, 1], [], []>} : vector<8x8xf32>, vector<8x32xf32>, vector<8x32xf32> -> vector<8x32xf32>
    %68 = arith.addf %62, %67 : vector<8x32xf32>
    %69 = vector.extract_strided_slice %51 {offsets = [3, 0, 0], sizes = [1, 8, 8], strides = [1, 1, 1]} : vector<4x8x8xf32> to vector<1x8x8xf32>
    %70 = vector.shape_cast %69 : vector<1x8x8xf32> to vector<8x8xf32>
    %c3 = arith.constant 3 : index
    %c0_23 = arith.constant 0 : index
    %c0_24 = arith.constant 0 : index
    %71 = vector.load %arg4[%c3, %c0_23, %c0_24] : memref<4x8x32xf32, #tpu.memory_space<vmem>>, vector<1x8x32xf32>
    %72 = vector.shape_cast %71 : vector<1x8x32xf32> to vector<8x32xf32>
    %cst_25 = arith.constant dense<0.000000e+00> : vector<8x32xf32>
    %73 = tpu.matmul %70, %72, %cst_25 {dimension_numbers = #tpu.dot_dimension_numbers<[1], [0], [0], [1], [0, 0, 1, 1], [], []>} : vector<8x8xf32>, vector<8x32xf32>, vector<8x32xf32> -> vector<8x32xf32>
    %74 = arith.addf %68, %73 : vector<8x32xf32>
    %c0_26 = arith.constant 0 : index
    %c0_27 = arith.constant 0 : index
    %75 = vector.load %arg5[%c0_26, %c0_27] : memref<1x32xf32, #tpu.memory_space<vmem>>, vector<1x32xf32>
    %76 = vector.broadcast %75 : vector<1x32xf32> to vector<8x32xf32>
    %77 = arith.addf %74, %76 : vector<8x32xf32>
    %c0_28 = arith.constant 0 : index
    %c0_29 = arith.constant 0 : index
    %c0_30 = arith.constant 0 : index
    %78 = vector.load %arg6[%c0_28, %c0_29, %c0_30] : memref<1x8x32xf32, #tpu.memory_space<vmem>>, vector<1x8x32xf32>
    %79 = vector.shape_cast %78 : vector<1x8x32xf32> to vector<8x32xf32>
    %80 = vector.shape_cast %77 : vector<8x32xf32> to vector<1x8x32xf32>
    tpu.vector_store %arg6[%c0_28, %c0_29, %c0_30], %80 {strides = array<i32>} : memref<1x8x32xf32, #tpu.memory_space<vmem>>, vector<1x8x32xf32>,
    return
  }
  func.func @transform_0(%arg0: i32) -> (i32, i32, i32, i32) {
    %c0_i32 = arith.constant 0 : i32
    %c0_i32_0 = arith.constant 0 : i32
    %c0_i32_1 = arith.constant 0 : i32
    %c0_i32_2 = arith.constant 0 : i32
    return %c0_i32, %arg0, %c0_i32_0, %c0_i32_1 : i32, i32, i32, i32
  }
  func.func @transform_1(%arg0: i32) -> (i32, i32, i32) {
    %c0_i32 = arith.constant 0 : i32
    %c0_i32_0 = arith.constant 0 : i32
    %c0_i32_1 = arith.constant 0 : i32
    %c0_i32_2 = arith.constant 0 : i32
    return %c0_i32, %c0_i32_0, %c0_i32_1 : i32, i32, i32
  }
  func.func @transform_2(%arg0: i32) -> (i32, i32, i32) {
    %c0_i32 = arith.constant 0 : i32
    %c0_i32_0 = arith.constant 0 : i32
    %c0_i32_1 = arith.constant 0 : i32
    %c0_i32_2 = arith.constant 0 : i32
    return %c0_i32, %c0_i32_0, %c0_i32_1 : i32, i32, i32
  }
  func.func @transform_3(%arg0: i32) -> (i32, i32, i32) {
    %c0_i32 = arith.constant 0 : i32
    %c0_i32_0 = arith.constant 0 : i32
    %c0_i32_1 = arith.constant 0 : i32
    %c0_i32_2 = arith.constant 0 : i32
    return %c0_i32, %c0_i32_0, %c0_i32_1 : i32, i32, i32
  }
  func.func @transform_4(%arg0: i32) -> (i32, i32) {
    %c0_i32 = arith.constant 0 : i32
    %c0_i32_0 = arith.constant 0 : i32
    %c0_i32_1 = arith.constant 0 : i32
    return %c0_i32, %c0_i32_0 : i32, i32
  }
  func.func @transform_5(%arg0: i32) -> (i32, i32, i32) {
    %c0_i32 = arith.constant 0 : i32
    %c0_i32_0 = arith.constant 0 : i32
    %c0_i32_1 = arith.constant 0 : i32
    return %arg0, %c0_i32, %c0_i32_0 : i32, i32, i32
  }
}

</mosaic_0001>

<bundles_post_ra>
// kernel: tpu_custom_call.1
= control target key start
LH: loop header
LB: loop body
LE: loop exit
PB: predicated region body
PF: predicated region fallthrough
CT: control target
= control target key end

     0   :  { %s1461_s0 = inlined_call_operand.hbm [shape: f32[3,2,8,32], index: 0, kind: input, shape index: {}]   ;;  %s1462_s1 = inlined_call_operand.hbm [shape: f32[3,32,32], index: 1, kind: input, shape index: {}]   ;;  %s1463_s2 = inlined_call_operand.hbm [shape: f32[3,1,32], index: 2, kind: input, shape index: {}]   ;;  %s1464_s3 = inlined_call_operand.hbm [shape: f32[4,8,32], index: 3, kind: input, shape index: {}]   ;;  %s1465_s4 = inlined_call_operand.vmem [shape: f32[1,32], index: 4, kind: input, shape index: {}]   ;;  %s1466_s5 = inlined_call_operand.hbm [shape: f32[2,8,32], index: 5, kind: output, shape index: {}]  }
   0x1   :  { %1469 = sst [smem:[#allocation15_spill]] %s1462_s1 }
   0x2   :  { %10 = vsyncpa [#allocation3], 0 }
   0x3   :  { %12 = vsyncpa [#allocation3 + $0x1], 0 }
   0x4   :  { %13 = vsyncpa [#allocation6], 0 }
   0x5   :  { %14 = vsyncpa [#allocation9], 0 }
   0x6   :  { %15 = vsyncpa [#allocation4], 0 }
   0x7   :  { %17 = vsyncpa [#allocation4 + $0x1], 0  ;;  %s1249_s18 = smov 0   ;;  %s1251_s19 = smov 0  }
   0x8   :  { %s1253_s20 = smov 0   ;;  %s1255_s21 = smov 0  }
   0x9 LB: > { %s1270_s22 = sadd.s32 4294967295, %s1206_s21   ;;  %s870_s23 = sadd.s32 4294967294, %s1206_s21   ;;  %s1206_s21 = sphi %s1255_s21, %s1483_s21   ;;  %s1202_s20 = sphi %s1253_s20, %s1482_s20   ;;  %s1198_s19 = sphi %s1251_s19, %s1481_s19   ;;  %s1194_s18 = sphi %s1249_s18, %s1480_s18  }
   0xa   : > { %p43_p0 = scmp.ne.s32.totalorder %s1198_s19, %s1194_s18  ;;  %p44_p1 = scmp.eq.s32.totalorder %s1270_s22, 0 }
   0xb   : > { %p151_p2 = scmp.eq.s32.totalorder %s1270_s22, 1  ;;  %p157_p3 = scmp.eq.s32.totalorder %s870_s23, 1 }
   0xc   : > { %p1279_p4 = por %p44_p1, %p43_p0  ;;  %p871_p5 = scmp.ge.s32.totalorder %s1206_s21, 1 }
   0xd   : > { %p1284_p6 = por %p157_p3, %p43_p0  ;;  %p164_p7 = scmp.lt.s32.totalorder %s1206_s21, 3 }
   0xe   : > { %s1472_s1 = sld [smem:[#allocation15_spill]]  ;;  %s1208_s30 = smov [#allocation5]  }
   0xf   : > { %p1292_p8 = pnand %p871_p5, %p164_p7  ;;  %s177_s6 = sshll.u32 %s1208_s30, 4  ;;  %s178_s6 = int_to_ptr.vmem [resolvable:$true] %s177_s6 }
  0x10   : > { %s189_s10 = sshll.u32 %s1463_s2, 4  ;;  %s1467_s11 = smov 128   ;;  %s190_s10 = int_to_ptr.hbm [resolvable:$true] %s189_s10 }
  0x11   : > { %p923_p9 = pneg %p1292_p8  ;;  %s1468_s12 = smov 8  }
  0x12   : > { %s1211_s13 = smov [#allocation7]   ;;  %s1212_s15 = smov 16  }
  0x13   : > { %p1300_p10 = pnand %p923_p9, %p44_p1  ;;  %s191_s14 = sshll.u32 %s1211_s13, 4  ;;  %s192_s14 = int_to_ptr.vmem [resolvable:$true] %s191_s14 }
  0x14   : > { %s175_s28 = sshll.u32 %s1472_s1, 4  ;;  %s1213_s16 = smov 1   ;;  %s176_s28 = int_to_ptr.hbm [resolvable:$true] %s175_s28 }
  0x15   : > { %926 = dma.hbm_to_vmem [thread:$0]  (!%p1300_p10), %s176_s28, 1536, %s178_s6, [#allocation6], %s1467_s11, %s1467_s11, %s1468_s12  }
  0x16   : > { %929 = dma.hbm_to_vmem [thread:$0]  (!%p1300_p10), %s190_s10, 48, %s192_s14, [#allocation6], %s1212_s15, %s1212_s15, %s1213_s16  }
  0x17   : > { %s203_s26 = sshll.u32 %s1464_s3, 4  ;;  %s1214_s27 = smov [#allocation8]   ;;  %s204_s26 = int_to_ptr.hbm [resolvable:$true] %s203_s26 }
  0x18   : > { %s205_s28 = sshll.u32 %s1214_s27, 4  ;;  %s1324_s30 = sadd.s32 1, %s1206_s21   ;;  %s206_s28 = int_to_ptr.vmem [resolvable:$true] %s205_s28 }
  0x19   : > { %932 = dma.hbm_to_vmem [thread:$0]  (!%p1300_p10), %s204_s26, 512, %s206_s28, [#allocation9], %s1467_s11, %s1467_s11, %s1468_s12  }
  0x1a   : > { %s27_s6 = ssub.s32 %s1206_s21, %s1324_s30  ;;  %s30_s8 = sadd.s32 1, %s1202_s20 }
  0x1b   : > { %p28_p12 = scmp.eq.s32.totalorder %s27_s6, 0  ;;  %p37_p13 = scmp.ne.s32.totalorder %s1202_s20, %s1198_s19 }
  0x1c   : > { %p38_p0 = scmp.eq.s32.totalorder %s1206_s21, 0  ;;  %p944_p3 = scmp.lt.s32.totalorder %s1206_s21, 2 }
  0x1d   : > { %s1334_s9 = scalar_select %p28_p12, %s1202_s20, %s30_s8  }
  0x1e   : > { %p39_p5 = por %p38_p0, %p37_p13  ;;  %p1338_p7 = por %p151_p2, %p37_p13 }
  0x1f   : > { %s222_s7 = sand.u32 1, %s1202_s20   ;;  %s876_s13 = sshll.u32 %s1206_s21, 3 }
  0x20   : > { %s905_s14 = smul.u32 24, %s222_s7  ;;  %s230_s17 = scalar_lea.hbm %s1461_s0, %s876_s13 }
  0x21   : > { %p1347_p9 = pnand %p944_p3, %p39_p5  ;;  %s231_s26 = sshll.u32 %s230_s17, 4  ;;  %s232_s26 = int_to_ptr.hbm [resolvable:$true] %s231_s26 }
  0x22   : > { %s226_s27 = scalar_lea.vmem [#allocation2], %s905_s14  ;;  %s223_s6 = scalar_lea.sflag [#allocation3], %s222_s7 }
  0x23   : > { %s233_s28 = sshll.u32 %s226_s27, 4  ;;  %s1102_s8 = sshra.s32 %s232_s26, 4  ;;  %s234_s28 = int_to_ptr.vmem [resolvable:$true] %s233_s28  ;;  %s1103_s8 = int_to_ptr.hbm [resolvable:$true] %s1102_s8 }
  0x24   : > { %s1104_s11 = scalar_lea.hbm %s1103_s8, 24  ;;  %p1106_p10 = pneg %p1347_p9 }
  0x25   : > { %p1105_p2 = scmp.ne.s32.totalorder %s1103_s8, %s1104_s11  ;;  %s1109_s16 = scalar_lea.hbm %s1461_s0, 48 }
  0x26   : > { %p1110_p0 = scmp.lt.s32.totalorder %s1103_s8, %s1461_s0  ;;  %p1111_p3 = scmp.lt.s32.totalorder %s1109_s16, %s1104_s11 }
  0x27   : > { %p1107_p12 = pnand %p1106_p10, %p1105_p2 }
  0x28   : > { %p1112_p5 = por %p1111_p3, %p1110_p0 }
  0x29   : > { %p1108_p13 = pneg %p1107_p12 }
  0x2b   : > { %p1113_p11 = pnand %p1112_p5, %p1108_p13 }
  0x2d   : > { %1116 = shalt.err (!%p1113_p11)
}
  0x2e   : > { %s1215_s7 = smov 256   ;;  %s1477_s14 = smov 8  }
  0x2f   : > { %s1478_s17 = smov 128   ;;  %245 = sbr.rel (%p1292_p8) target bundleno = 983 (0x3d7), region = 40 }
  0x30   : > { %936 = dma.hbm_to_vmem [thread:$0]  (!%p1347_p9), %s232_s26, 384, %s234_s28, %s223_s6, %s1215_s7, %s1478_s17, %s1477_s14  }
  0x31   : > { %s1366_s27 = sand.u32 (!%p1292_p8), 1, %s1198_s19  }
  0x32   : > { %s906_s1 = smul.u32 (!%p1292_p8), 24, %s1366_s27  ;;  %s248_s11 = scalar_lea.sflag (!%p1292_p8), [#allocation3], %s1366_s27 }
  0x34   : > { %s1370_s12 = scalar_lea.vmem [#allocation2], %s906_s1 }
  0x35   : > { %1177 = dma.done.wait (%p1279_p4), %s248_s11, 384  }
  0x36   : > { %1179 = vsyncadd (%p1279_p4), %s248_s11, 4294966912 }
  0x37   : > { %1181 = dma.done.wait (%p44_p1), [#allocation6], 1584  }
  0x38   : > { %1183 = vsyncadd (%p44_p1), [#allocation6], 4294965712 }
  0x39   : > { %1185 = dma.done.wait (%p44_p1), [#allocation9], 512  }
  0x3a   : > { %1187 = vsyncadd (%p44_p1), [#allocation9], 4294966784  ;;  %v304_v0 = vld [vmem:[#allocation5 + $0x38] sm:$0xff]  ;;  %v303_v1 = vld [vmem:[#allocation5 + $0x30] sm:$0xff]  ;;  %vm321_vm0 = vcmask 261120   ;;  %vm415_vm1 = vcmask 64512  }
  0x3b   : > { %v300_v2 = vld [vmem:[#allocation5 + $0x18] sm:$0xff]  ;;  %360 = vmatpush.msra.mxu1 %v304_v0  ;;  %v299_v3 = vld [vmem:[#allocation5 + $0x10] sm:$0xff]  ;;  %v302_v4 = vld [vmem:[#allocation5 + $0x28] sm:$0xff]  ;;  %s1216_s24 = smov 112   ;;  %s1217_s29 = smov 120  }
  0x3c   : > { %337 = vmatpush.msra.mxu0 %v300_v2  ;;  %v298_v5 = vld [vmem:[#allocation5 + $0x8] sm:$0xff]  ;;  %v301_v6 = vld [vmem:[#allocation5 + $0x20] sm:$0xff]  ;;  %v295_v8 = vld [vmem:[%s1370_s12 + $0x8] sm:$0xff]  ;;  %s1218_s23 = smov 104   ;;  %s881_s26 = sshll.u32 %s1366_s27, 3 }
  0x3d   : > { %361 = vmatpush.msra.mxu1 %v303_v1  ;;  %v297_v7 = vld [vmem:[#allocation5] sm:$0xff]  ;;  %v294_v9 = vld [vmem:[%s1370_s12] sm:$0xff]  ;;  %v308_v24 = vld [vmem:[#allocation5 + $0x58] sm:$0xff]  ;;  %s902_s28 = sshll.u32 %s1270_s22, 3  ;;  %s293_s7 = scalar_lea.vmem [#allocation10], %s881_s26 }
  0x3e   : > { %338 = vmatpush.msra.mxu0 %v299_v3  ;;  %v992_v10 = vld [vmem:[#allocation7 + $0x1] ss:$0 sm:$0xff]  ;;  %v993_v11 = vld [vmem:[#allocation7] ss:$0 sm:$0xff]  ;;  %v307_v25 = vld [vmem:[#allocation5 + $0x50] sm:$0xff]  ;;  %383 = vmatpush.msra.mxu2 %v308_v24  ;;  %s766_s13 = scalar_lea.hbm %s1466_s5, %s902_s28  ;;  %s768_s14 = sshll.u32 %s293_s7, 4  ;;  %s769_s14 = int_to_ptr.vmem [resolvable:$true] %s768_s14 }
  0x3f   : > { %362 = vmatpush.msra.mxu1 %v302_v4  ;;  %v306_v26 = vld [vmem:[#allocation5 + $0x48] sm:$0xff]  ;;  %v305_v27 = vld [vmem:[#allocation5 + $0x40] sm:$0xff]  ;;  %s770_s17 = sshll.u32 %s766_s13, 4  ;;  %s756_s22 = scalar_lea.sflag [#allocation4], %s1366_s27  ;;  %s771_s17 = int_to_ptr.hbm [resolvable:$true] %s770_s17 }
  0x40   : > { %339 = vmatpush.msra.mxu0 %v298_v5  ;;  %384 = vmatpush.msra.mxu2 %v307_v25  ;;  %v296_v28 = vld [vmem:[%s1370_s12 + $0x10] sm:$0xff]  ;;  %s1146_s1 = sshra.s32 %s771_s17, 4  ;;  %s1147_s1 = int_to_ptr.hbm [resolvable:$true] %s1146_s1 }
  0x41   : > { %363 = vmatpush.msra.mxu1 %v301_v6  ;;  %v994_v40 = vld [vmem:[#allocation7 + $0x2] ss:$0 sm:$0xff]  ;;  %v648_v62 = vld [vmem:[#allocation8] sm:$0xff]  ;;  %s1148_s11 = scalar_lea.hbm %s1147_s1, 8  ;;  %p1153_p11 = scmp.lt.s32.totalorder %s1147_s1, %s1466_s5 }
  0x42   : > { %340 = vmatpush.msra.mxu0 %v297_v7  ;;  %883 = vmatmul.msk.f32.vlgmr.msra.gmra.mxu1 %vm321_vm0, %v295_v8  ;;  %p1149_p1 = scmp.ne.s32.totalorder %s1147_s1, %s1148_s11 }
  0x43   : > { %882 = vmatmul.msk.f32.vlgmr.msra.gmra.mxu0 %vm321_vm0, %v294_v9  ;;  %385 = vmatpush.msra.mxu2 %v306_v26 }
  0x44   : > { %p1150_p4 = pnand %p1149_p1, %p1338_p7 }
  0x45   : > { %386 = vmatpush.msra.mxu2 %v305_v27 }
  0x46   : > { %884 = vmatmul.msk.f32.vlgmr.msra.gmra.mxu2 %vm321_vm0, %v296_v28  ;;  %p1151_p8 = pneg %p1150_p4 }
  0xbf   : > { %v365_v12 = vpop.f32.mrf.mxu1 }
  0xc0   : > { %v342_v13 = vpop.f32.mrf.mxu0  ;;  %v366_v14 = vadd.f32 %v992_v10, %v365_v12  ;;  %v650_v12 = vld [vmem:[#allocation8 + $0x8] sm:$0xff] }
  0xc1   : > { %v343_v15 = vadd.f32 %v993_v11, %v342_v13  ;;  %v698_v11 = vld [vmem:[#allocation8 + $0x10] sm:$0xff]  ;;  %v724_v13 = vld [vmem:[#allocation8 + $0x18] sm:$0xff] }
  0xc2   : > { %401 = vrot.lane.b32.xlu1 %v366_v14, %s1216_s24  ;;  %399 = vrot.lane.b32.xlu0 %v366_v14, %s1217_s29 }
  0xc3   : > { %885 = vmatpush.xpose.msk.msra.mxu3 %vm415_vm1, %v366_v14  ;;  %394 = vrot.lane.b32.xlu2 %v343_v15, %s1216_s24 }
  0xc6   : > { %886 = vmatmul.msk.f32.vlgmr.msra.gmra.mxu3 %vm415_vm1, %v343_v15 }
  0xc9   : > { %v388_v41 = vpop.f32.mrf.mxu2 }
  0xca   : > { %403 = vrot.lane.b32.xlu1 %v366_v14, %s1218_s23  ;;  %392 = vrot.lane.b32.xlu0 %v343_v15, %s1217_s29  ;;  %v389_v42 = vadd.f32 %v994_v40, %v388_v41 }
  0xcb   : > { %396 = vrot.lane.b32.xlu2 %v343_v15, %s1218_s23 }
  0xcc   : > { %574 = vmatpush.msrb.mxu2 %v389_v42 }
  0xce   : > { %669 = vmatpush.msra.mxu2 %v650_v12 }
 0x11d   : > { %v395_v18 = vpop.permute.xlu2 %394 }
 0x125   : > { %v397_v21 = vpop.permute.xlu2 %396 }
 0x134   : > { %v402_v16 = vpop.permute.xlu1 %401  ;;  %v400_v17 = vpop.permute.xlu0 %399 }
 0x135   : > { %887 = vmatpush.xpose.msk.msrb.mxu3 %vm415_vm1, %v400_v17  ;;  %889 = vmatpush.xpose.msk.msrb.mxu0 %vm415_vm1, %v402_v16 }
 0x138   : > { %890 = vmatmul.msk.f32.vlgmr.msrb.gmra.mxu0 %vm415_vm1, %v395_v18 }
 0x13c   : > { %v404_v19 = vpop.permute.xlu1 %403  ;;  %v393_v20 = vpop.permute.xlu0 %392 }
 0x13d   : > { %888 = vmatmul.msk.f32.vlgmr.msrb.gmra.mxu3 %vm415_vm1, %v393_v20  ;;  %891 = vmatpush.xpose.msk.msrb.mxu1 %vm415_vm1, %v404_v19 }
 0x140   : > { %892 = vmatmul.msk.f32.vlgmr.msrb.gmra.mxu1 %vm415_vm1, %v397_v21 }
 0x149   : > { %v437_v22 = vpop.f32.mrf.mxu3 }
 0x14a   : > { %v512_v23 = vsel %vm415_vm1, %v437_v22, -inf }
 0x14b   : > { %513 = vmax.xlane.f32.xlu0 %v512_v23 }
 0x1b5   : > { %v485_v29 = vpop.f32.mrf.mxu0 }
 0x1b6   : > { %v518_v30 = vsel %vm415_vm1, %v485_v29, -inf }
 0x1b7   : > { %519 = vmax.xlane.f32.xlu2 %v518_v30 }
 0x1bd   : > { %v509_v31 = vpop.f32.mrf.mxu1 }
 0x1be   : > { %v514_v32 = vpop.xlane.xlu0 %513  ;;  %v521_v33 = vsel %vm415_vm1, %v509_v31, -inf }
 0x1bf   : > { %v524_v34 = vsub.f32 %v437_v22, %v514_v32  ;;  %522 = vmax.xlane.f32.xlu2 %v521_v33  ;;  %v995_v22 = vld [vmem:[%s1465_s4] ss:$0 sm:$0xff] }
 0x1c0   : > { %v461_v35 = vpop.f32.mrf.mxu3 }
 0x1c1   : > { %v528_v36 = vmul.f32 1.442695, %v524_v34  ;;  %v515_v37 = vsel %vm415_vm1, %v461_v35, -inf }
 0x1c2   : > { %516 = vmax.xlane.f32.xlu1 %v515_v37 }
 0x1c3   : > { %996 = vpow2.f32 %v528_v36 }
 0x1c9   : > { %v997_v38 = vpop.eup %996 }
 0x1ca   : > { %v536_v39 = vsel %vm415_vm1, %v997_v38, 0.0 }
 0x1cb   : > { %537 = vadd.xlane.f32.xlu0 %v536_v39 }
 0x1d7   : > { %406 = vrot.lane.b32.xlu2 %v389_v42, %s1217_s29  ;;  %s1152_s29 = scalar_lea.hbm %s1466_s5, 16 }
 0x1d8   : > { %p1154_p9 = scmp.lt.s32.totalorder %s1152_s29, %s1148_s11 }
 0x1da   : > { %p1155_p2 = por %p1154_p9, %p1153_p11 }
 0x1dc   : > { %p1156_p10 = pnand %p1155_p2, %p1151_p8 }
 0x22a   : > { %v520_v43 = vpop.xlane.xlu2 %519 }
 0x22b   : > { %v526_v44 = vsub.f32 %v485_v29, %v520_v43 }
 0x22d   : > { %v532_v45 = vmul.f32 1.442695, %v526_v44 }
 0x22f   : > { %998 = vpow2.f32 %v532_v45 }
 0x232   : > { %v523_v46 = vpop.xlane.xlu2 %522 }
 0x233   : > { %v527_v47 = vsub.f32 %v509_v31, %v523_v46 }
 0x235   : > { %v999_v48 = vpop.eup %998  ;;  %v534_v49 = vmul.f32 1.442695, %v527_v47  ;;  %v517_v50 = vpop.xlane.xlu1 %516 }
 0x236   : > { %v525_v51 = vsub.f32 %v461_v35, %v517_v50  ;;  %v542_v52 = vsel %vm415_vm1, %v999_v48, 0.0 }
 0x237   : > { %1000 = vpow2.f32 %v534_v49  ;;  %543 = vadd.xlane.f32.xlu0 %v542_v52 }
 0x238   : > { %v530_v53 = vmul.f32 1.442695, %v525_v51 }
 0x23a   : > { %1002 = vpow2.f32 %v530_v53  ;;  %v407_v61 = vpop.permute.xlu2 %406 }
 0x23b   : > { %597 = vmatpush.msra.mxu3 %v407_v61 }
 0x23d   : > { %v1001_v54 = vpop.eup %1000  ;;  %692 = vmatpush.msrb.mxu3 %v648_v62 }
 0x23e   : > { %v538_v55 = vpop.xlane.xlu0 %537  ;;  %v545_v56 = vsel %vm415_vm1, %v1001_v54, 0.0 }
 0x23f   : > { %1004 = vrcp.f32 %v538_v55  ;;  %546 = vadd.xlane.f32.xlu1 %v545_v56 }
 0x240   : > { %v1003_v57 = vpop.eup %1002 }
 0x241   : > { %v539_v60 = vsel %vm415_vm1, %v1003_v57, 0.0 }
 0x245   : > { %v1005_v58 = vpop.eup %1004 }
 0x246   : > { %v552_v59 = vmul.f32 %v1005_v58, %v997_v38 }
 0x247   : > { %540 = vadd.xlane.f32.xlu1 %v539_v60 }
 0x248   : > { %893 = vmatmul.msk.f32.vlgmr.msrb.gmra.mxu2 %vm415_vm1, %v552_v59 }
 0x24b   : > { %409 = vrot.lane.b32.xlu0 %v389_v42, %s1216_s24 }
 0x260   : > { %412 = vrot.lane.b32.xlu1 %v389_v42, %s1218_s23 }
 0x2aa   : > { %v544_v63 = vpop.xlane.xlu0 %543 }
 0x2ab   : > { %1006 = vrcp.f32 %v544_v63 }
 0x2b1   : > { %v1007_v1 = vpop.eup %1006 }
 0x2b2   : > { %v547_v0 = vpop.xlane.xlu1 %546  ;;  %v554_v3 = vmul.f32 %v1007_v1, %v999_v48 }
 0x2ba   : > { %v541_v2 = vpop.xlane.xlu1 %540 }
 0x2bb   : > { %1008 = vrcp.f32 %v541_v2 }
 0x2bc   : > { %1010 = vrcp.f32 %v547_v0 }
 0x2bd   : > { %v410_v4 = vpop.permute.xlu0 %409 }
 0x2be   : > { %620 = vmatpush.msra.mxu0 %v410_v4 }
 0x2bf   : > { %895 = vmatmul.msk.f32.vlgmr.msra.gmra.mxu0 %vm415_vm1, %v554_v3 }
 0x2c0   : > { %717 = vmatpush.msrb.mxu0 %v698_v11 }
 0x2c1   : > { %v1009_v5 = vpop.eup %1008 }
 0x2c2   : > { %v553_v6 = vmul.f32 %v1009_v5, %v1003_v57  ;;  %v1011_v8 = vpop.eup %1010 }
 0x2c3   : > { %v555_v9 = vmul.f32 %v1011_v8, %v1001_v54 }
 0x2c4   : > { %894 = vmatmul.msk.f32.vlgmr.msra.gmra.mxu3 %vm415_vm1, %v553_v6 }
 0x2cb   : > { %v576_v7 = vpop.f32.mrf.mxu2 }
 0x2cc   : > { %898 = vmatmul.msk.f32.vlgmr.msrb.gmra.mxu3 %vm415_vm1, %v576_v7 }
 0x2d2   : > { %v413_v10 = vpop.permute.xlu1 %412 }
 0x2d3   : > { %643 = vmatpush.msra.mxu1 %v413_v10 }
 0x2d4   : > { %896 = vmatmul.msk.f32.vlgmr.msra.gmra.mxu1 %vm415_vm1, %v555_v9 }
 0x2d5   : > { %743 = vmatpush.msrb.mxu1 %v724_v13 }
 0x33c   : > { %v622_v14 = vpop.f32.mrf.mxu0 }
 0x33d   : > { %899 = vmatmul.msk.f32.vlgmr.msrb.gmra.mxu0 %vm415_vm1, %v622_v14 }
 0x347   : > { %v599_v15 = vpop.f32.mrf.mxu3 }
 0x348   : > { %897 = vmatmul.msk.f32.vlgmr.msra.gmra.mxu2 %vm415_vm1, %v599_v15 }
 0x34f   : > { %v694_v17 = vpop.f32.mrf.mxu3 }
 0x351   : > { %v645_v16 = vpop.f32.mrf.mxu1 }
 0x352   : > { %900 = vmatmul.msk.f32.vlgmr.msrb.gmra.mxu1 %vm415_vm1, %v645_v16 }
 0x3ba   : > { %v719_v20 = vpop.f32.mrf.mxu0 }
 0x3cb   : > { %v671_v18 = vpop.f32.mrf.mxu2 }
 0x3cc   : > { %v695_v19 = vadd.f32 %v694_v17, %v671_v18 }
 0x3ce   : > { %v722_v21 = vadd.f32 %v719_v20, %v695_v19 }
 0x3cf   : > { %v745_v23 = vpop.f32.mrf.mxu1 }
 0x3d0   : > { %v748_v24 = vadd.f32 %v745_v23, %v722_v21 }
 0x3d2   : > { %v753_v25 = vadd.f32 %v995_v22, %v748_v24 }
 0x3d4   : > { %754 = vst.msk [vmem:[%s293_s7] sm:$0xff] %vm321_vm0, %v753_v25 }
 0x3d5   : > { %1159 = shalt.err (!%p1156_p10)
}
 0x3d6   : > { %921 = dma.vmem_to_hbm [thread:$0]  (%p1338_p7), %s769_s14, 128, %s771_s17, %s756_s22  }
 0x3d7 PF: > { %s782_s27 = sand.u32 1, %s1194_s18   ;;  %p1479_p12 = scmp.ge.s32.totalorder %s1206_s21, 2 }
 0x3d8   : > { %s783_s28 = scalar_lea.sflag [#allocation4], %s782_s27 }
 0x3d9   : > { %p938_p13 = pnand %p1479_p12, %p1284_p6 }
 0x3db   : > { %p939_p0 = pneg %p938_p13 }
 0x3dd   : > { %1189 = dma.done.wait (%p939_p0), %s783_s28, 128  }
 0x3de   : > { %1191 = vsyncadd (%p939_p0), %s783_s28, 4294967168  ;;  %p20_p3 = scmp.ge.s32.totalorder %s1324_s30, 4   ;;  %s1480_s18 = smov %s1198_s19 }
 0x3df   : > { %s1481_s19 = smov %s1202_s20  ;;  %s1482_s20 = smov %s1334_s9 }
 0x3e0   : > { %s1483_s21 = smov %s1324_s30  ;;  %22 = sbr.rel (!%p20_p3) target bundleno = 9 (0x9), region = 100 }
 0x3e5   :  { %789 = vsyncpa [#allocation3], 1 }
 0x3e6   :  { %791 = vsyncpa [#allocation3 + $0x1], 1 }
 0x3e7   :  { %792 = vsyncpa [#allocation6], 1 }
 0x3e8   :  { %793 = vsyncpa [#allocation9], 1 }
 0x3e9   :  { %794 = vsyncpa [#allocation4], 1 }
 0x3ea   :  { %796 = vsyncpa [#allocation4 + $0x1], 1 }

</bundles_post_ra>
